<compile_context>
chip_gen: v7x
topology: tpu7x:2x2x1
jax: 0.10.0
libtpu: 0.0.40
codegen_flags: <defaults>
</compile_context>

<pallas_src>
import functools
import math

import jax
import jax.numpy as jnp
from jax.experimental import pallas as pl
from jax.experimental.pallas import tpu as pltpu

_LANE = 128


def _round_up(v, m):
    return ((v + m - 1) // m) * m


def _cdiv(a, b):
    return (a + b - 1) // b


def _pad_to(arr, shape):
    pads = [(0, t - s) for s, t in zip(arr.shape, shape)]
    if any(hi for _, hi in pads):
        arr = jnp.pad(arr, pads)
    return arr


def _vmem_capacity_bytes():
    # 64 MiB is the conservative (v7x per-TensorCore) fallback.
    try:
        info = pltpu.get_tpu_info()
        return int(getattr(info, "vmem_capacity_bytes", 64 * 1024 * 1024))
    except Exception:
        return 64 * 1024 * 1024


# ---------------------------------------------------------------------------
# Path 1: tiny shapes -> one fused grid step over all batches.
# ---------------------------------------------------------------------------
def _gcn_small_kernel(x_ref, adj_ref, w_ref, b_ref, o_ref, *, compute_dtype):
    # x_ref:   (B, N, F_in)       native dtype
    # adj_ref: (B, N, N)          native dtype
    # w_ref:   (F_in, F_out_pad)  compute dtype
    # b_ref:   (1, F_out_pad)     f32
    # o_ref:   (B, N, F_out_pad)
    B, N, F_in = x_ref.shape
    w = w_ref[...]
    b = b_ref[...]
    # One fused support matmul over all batches (fuller MXU tiles than B tiny
    # (N, F_in) matmuls), then per-batch adjacency matmuls.
    x_all = x_ref[...].reshape(B * N, F_in).astype(compute_dtype)
    support = jnp.dot(x_all, w, preferred_element_type=jnp.float32)
    support = support.astype(compute_dtype)
    for i in range(B):  # B is small & static: unrolled
        out = jnp.dot(adj_ref[i].astype(compute_dtype),
                      support[i * N:(i + 1) * N],
                      preferred_element_type=jnp.float32)
        o_ref[i] = (out + b).astype(o_ref.dtype)


def _gcn_small(x, adj, w, b, out_dtype, compute_dtype):
    B, N, F_in = x.shape
    F_out_pad = w.shape[1]
    flops = 2 * B * N * F_in * F_out_pad + 2 * B * N * N * F_out_pad
    bytes_accessed = int(
        x.size * x.dtype.itemsize + adj.size * adj.dtype.itemsize
        + w.size * w.dtype.itemsize + b.size * b.dtype.itemsize
        + B * N * F_out_pad * jnp.dtype(out_dtype).itemsize)
    kernel = functools.partial(_gcn_small_kernel, compute_dtype=compute_dtype)
    return pl.pallas_call(
        kernel,
        out_shape=jax.ShapeDtypeStruct((B, N, F_out_pad), out_dtype),
        cost_estimate=pl.CostEstimate(flops=flops, transcendentals=0,
                                      bytes_accessed=bytes_accessed),
    )(x, adj, w, b)


# ---------------------------------------------------------------------------
# Path 2: node-tiled kernel with K-reduction accumulator, resident x.
# ---------------------------------------------------------------------------
def _gcn_tiled_kernel(x_ref, adj_ref, w_ref, b_ref, o_ref, acc_ref, *,
                      tk, compute_dtype):
    # x_ref:   (n_pad, F_in)      native dtype, VMEM-resident per batch
    # adj_ref: (TM, TK)           native dtype; cast on the VPU just-in-time
    # w_ref:   (F_in, F_out_pad)  compute dtype (constant index map -> resident)
    # b_ref:   (1, F_out_pad)     f32 bias
    # o_ref:   (TM, F_out_pad)
    # acc_ref: (TM, F_out_pad)    f32 accumulator scratch
    k = pl.program_id(2)

    @pl.when(k == 0)
    def _init():
        acc_ref[...] = jnp.zeros_like(acc_ref)

    # Recompute the (TK, F_out) support tile for this K block from the
    # VMEM-resident x: cheap relative to the adjacency matmul when N >> F_in,
    # and avoids re-streaming x from HBM N/TM times.
    k_start = pl.multiple_of(k * tk, _LANE)
    x_k = x_ref[pl.ds(k_start, tk), :].astype(compute_dtype)
    support = jnp.dot(x_k, w_ref[...], preferred_element_type=jnp.float32)
    # The adjacency HBM stream stays in its native dtype (read exactly once);
    # the MXU-input cast happens here on the VPU, which has slack.
    acc_ref[...] += jnp.dot(adj_ref[...].astype(compute_dtype),
                            support.astype(compute_dtype),
                            preferred_element_type=jnp.float32)

    @pl.when(k == pl.num_programs(2) - 1)
    def _finalize():
        o_ref[...] = (acc_ref[...] + b_ref[...]).astype(o_ref.dtype)


def _gcn_tiled(x, adj, w, b, out_dtype, compute_dtype, node_tile):
    B, N, F_in = x.shape
    F_out_pad = w.shape[1]
    x_bytes = x.dtype.itemsize
    adj_bytes = adj.dtype.itemsize
    w_bytes = w.dtype.itemsize
    out_bytes = jnp.dtype(out_dtype).itemsize

    # ---- choose a square node tile (TM == TK), multiple of 128 -------------
    cap = _vmem_capacity_bytes()
    budget = int(0.55 * cap)  # leave headroom for compiler-internal scratch

    def vmem_need(tile):
        n_pad = _round_up(N, tile)
        return (2 * tile * tile * adj_bytes          # adj double buffer
                + 2 * n_pad * F_in * x_bytes         # resident x (dbl-buffered)
                + 2 * F_in * F_out_pad * w_bytes     # weight
                + 2 * F_out_pad * 4                  # bias
                + 2 * tile * F_out_pad * out_bytes   # out double buffer
                + tile * F_out_pad * 4)              # accumulator scratch

    tile = _round_up(max(_LANE, min(node_tile, _round_up(N, _LANE))), _LANE)
    while tile > _LANE and vmem_need(tile) > budget:
        tile = _round_up(tile // 2, _LANE)
    # v7x megacore: keep >= 2 "parallel" grid steps when the shape allows it.
    if B * _cdiv(N, tile) < 2 and tile > _LANE:
        tile = _round_up(_cdiv(N, 2), _LANE)

    n_pad = _round_up(N, tile)
    tm = tk = tile
    grid = (B, n_pad // tm, n_pad // tk)

    x_p = _pad_to(x, (B, n_pad, F_in))
    adj_p = _pad_to(adj, (B, n_pad, n_pad))

    flops = int(2 * B * (n_pad // tm) * n_pad * F_in * F_out_pad   # support recompute
                + 2 * B * n_pad * n_pad * F_out_pad)               # adjacency matmul
    bytes_accessed = int(
        B * n_pad * F_in * x_bytes            # x: read once per batch (resident)
        + B * n_pad * n_pad * adj_bytes       # adjacency: read once, native dtype
        + F_in * F_out_pad * w_bytes + F_out_pad * 4
        + B * n_pad * F_out_pad * out_bytes)

    vmem_limit = min(max(32 * 1024 * 1024, vmem_need(tile) + 8 * 1024 * 1024),
                     int(0.75 * cap))

    kernel = functools.partial(_gcn_tiled_kernel, tk=tk,
                               compute_dtype=compute_dtype)
    return pl.pallas_call(
        kernel,
        out_shape=jax.ShapeDtypeStruct((B, n_pad, F_out_pad), out_dtype),
        grid_spec=pltpu.PrefetchScalarGridSpec(
            num_scalar_prefetch=0,
            grid=grid,
            in_specs=[
                # x: whole (padded) node-feature matrix, resident per batch
                # (block index constant over ii/kk -> no re-streaming).
                pl.BlockSpec((None, n_pad, F_in), lambda bb, ii, kk: (bb, 0, 0)),
                # adjacency: streamed tile-by-tile in its NATIVE dtype.
                pl.BlockSpec((None, tm, tk), lambda bb, ii, kk: (bb, ii, kk)),
                pl.BlockSpec((F_in, F_out_pad), lambda bb, ii, kk: (0, 0)),
                pl.BlockSpec((1, F_out_pad), lambda bb, ii, kk: (0, 0)),
            ],
            out_specs=pl.BlockSpec((None, tm, F_out_pad),
                                   lambda bb, ii, kk: (bb, ii, 0)),
            scratch_shapes=[pltpu.VMEM((tm, F_out_pad), jnp.float32)],
        ),
        compiler_params=pltpu.CompilerParams(
            dimension_semantics=("parallel", "parallel", "arbitrary"),
            vmem_limit_bytes=vmem_limit,
        ),
        cost_estimate=pl.CostEstimate(flops=flops, transcendentals=0,
                                      bytes_accessed=bytes_accessed),
    )(x_p, adj_p, w, b)


def graph_convolution(x, adj, weight, bias=None, *,
                      compute_dtype=jnp.bfloat16, node_tile=512):
    """GCN layer forward: adj @ (x @ weight) + bias, batched over dim 0.

    x: [B, N, F_in], adj: [B, N, N], weight: [F_in, F_out], bias: [F_out]|None.
    MXU operands run in `compute_dtype` (bf16 by default; the cast happens
    inside the kernel so HBM streams stay in native dtype); accumulation and
    the bias add stay in f32; output keeps x.dtype.
    """
    B, N, F_in = x.shape
    assert adj.shape == (B, N, N)
    assert weight.shape[0] == F_in
    F_out = weight.shape[1]
    out_dtype = x.dtype

    if bias is None:
        bias = jnp.zeros((F_out,), jnp.float32)

    # Lane-dense output: pad F_out to 128 (or a multiple of 256 once it
    # exceeds 128, matching the v6e/v7x 2x256 MXU) with zero weight/bias
    # columns; padding is sliced away after the kernel.
    F_out_pad = _round_up(F_out, _LANE)
    if F_out_pad > _LANE:
        F_out_pad = _round_up(F_out_pad, 2 * _LANE)
    w_p = _pad_to(weight.astype(compute_dtype), (F_in, F_out_pad))
    b_p = _pad_to(bias.astype(jnp.float32).reshape(1, F_out), (1, F_out_pad))

    # x and adj are passed in their native dtype (no wrapper-side bf16 copy).
    if N <= 128 and B <= 8 and N % 8 == 0:
        out = _gcn_small(x, adj, w_p, b_p, out_dtype, compute_dtype)
    else:
        out = _gcn_tiled(x, adj, w_p, b_p, out_dtype, compute_dtype, node_tile)

    return out[:, :N, :F_out]


def init_params(key, in_features, out_features):
    """Matches PyTorch reset_parameters: uniform(-stdv, stdv), stdv=1/sqrt(F_out)."""
    stdv = 1.0 / math.sqrt(out_features)
    kw, kb = jax.random.split(key)
    weight = jax.random.uniform(kw, (in_features, out_features), jnp.float32,
                                minval=-stdv, maxval=stdv)
    bias = jax.random.uniform(kb, (out_features,), jnp.float32,
                              minval=-stdv, maxval=stdv)
    return weight, bias


def _make_inputs(key, B, N, F_in):
    kx, ka = jax.random.split(key)
    x = jax.random.normal(kx, (B, N, F_in), jnp.float32)
    a = jax.random.uniform(ka, (B, N, N), jnp.float32)
    adj = 0.5 * (a + jnp.transpose(a, (0, 2, 1))) \
        + jnp.eye(N, dtype=jnp.float32)[None]
    return x, adj


if __name__ == "__main__":
    key = jax.random.PRNGKey(0)
    k_small, k_param, k_med, k_param2 = jax.random.split(key, 4)

    # ---- tiny shapes: fused single-step path -------------------------------
    B, N, F_in, F_out = 2, 8, 32, 32
    x, adj = _make_inputs(k_small, B, N, F_in)
    weight, bias = init_params(k_param, F_in, F_out)
    ref = jnp.matmul(adj, jnp.matmul(x, weight)) + bias

    out_f32 = jax.block_until_ready(
        graph_convolution(x, adj, weight, bias, compute_dtype=jnp.float32))
    assert out_f32.shape == (B, N, F_out)
    assert jnp.allclose(out_f32, ref, atol=1e-4, rtol=1e-4)

    out_bf16 = jax.block_until_ready(
        graph_convolution(x, adj, weight, bias))        # default bf16 MXU path
    assert jnp.allclose(out_bf16, ref, atol=5e-2, rtol=5e-2)

    # ---- medium shapes: tiled path (ragged N -> padded; F_out 96 -> 128) ---
    B2, N2, F_in2, F_out2 = 2, 200, 64, 96
    x2, adj2 = _make_inputs(k_med, B2, N2, F_in2)
    w2, b2 = init_params(k_param2, F_in2, F_out2)
    ref2 = jnp.matmul(adj2, jnp.matmul(x2, w2)) + b2
    scale2 = jnp.max(jnp.abs(ref2))

    # Small node_tile forces multiple K steps -> exercises the accumulator.
    out2_f32 = jax.block_until_ready(
        graph_convolution(x2, adj2, w2, b2, compute_dtype=jnp.float32,
                          node_tile=128))
    assert out2_f32.shape == (B2, N2, F_out2)
    assert jnp.max(jnp.abs(out2_f32 - ref2)) / scale2 < 1e-2

    out2_bf16 = jax.block_until_ready(
        graph_convolution(x2, adj2, w2, b2, node_tile=128))
    assert jnp.max(jnp.abs(out2_bf16 - ref2)) / scale2 < 1e-1

    # Default tile size (single K step per row tile).
    out2_def = jax.block_until_ready(graph_convolution(x2, adj2, w2, b2))
    assert jnp.max(jnp.abs(out2_def - ref2)) / scale2 < 1e-1

    print("KERNEL_OK")
</pallas_src>

<mosaic_0001>
module attributes {stable_mosaic.version = 11 : i64} {
  func.func @_gcn_small_kernel(%arg0: memref<2x8x32xf32, #tpu.memory_space<vmem>>, %arg1: memref<2x8x8xf32, #tpu.memory_space<vmem>>, %arg2: memref<32x128xf32, #tpu.memory_space<vmem>>, %arg3: memref<1x128xf32, #tpu.memory_space<vmem>>, %arg4: memref<2x8x128xf32, #tpu.memory_space<vmem>>) attributes {dimension_semantics = [], scalar_prefetch = 0 : i64, scratch_operands = 0 : i64, tpu.core_type = #tpu.core_type<tc>} {
    %c0 = arith.constant 0 : index
    %c0_0 = arith.constant 0 : index
    %0 = vector.load %arg2[%c0, %c0_0] : memref<32x128xf32, #tpu.memory_space<vmem>>, vector<32x128xf32>
    %c0_1 = arith.constant 0 : index
    %c0_2 = arith.constant 0 : index
    %1 = vector.load %arg3[%c0_1, %c0_2] : memref<1x128xf32, #tpu.memory_space<vmem>>, vector<1x128xf32>
    %c0_3 = arith.constant 0 : index
    %c0_4 = arith.constant 0 : index
    %c0_5 = arith.constant 0 : index
    %2 = vector.load %arg0[%c0_3, %c0_4, %c0_5] : memref<2x8x32xf32, #tpu.memory_space<vmem>>, vector<2x8x32xf32>
    %3 = vector.shape_cast %2 : vector<2x8x32xf32> to vector<16x32xf32>
    %cst = arith.constant dense<0.000000e+00> : vector<16x128xf32>
    %4 = tpu.matmul %3, %0, %cst {dimension_numbers = #tpu.dot_dimension_numbers<[1], [0], [0], [1], [0, 0, 1, 1], [], []>} : vector<16x32xf32>, vector<32x128xf32>, vector<16x128xf32> -> vector<16x128xf32>
    %c0_6 = arith.constant 0 : index
    %c0_7 = arith.constant 0 : index
    %c0_8 = arith.constant 0 : index
    %5 = vector.load %arg1[%c0_6, %c0_7, %c0_8] : memref<2x8x8xf32, #tpu.memory_space<vmem>>, vector<1x8x8xf32>
    %6 = vector.shape_cast %5 : vector<1x8x8xf32> to vector<8x8xf32>
    %7 = vector.extract_strided_slice %4 {offsets = [0, 0], sizes = [8, 128], strides = [1, 1]} : vector<16x128xf32> to vector<8x128xf32>
    %cst_9 = arith.constant dense<0.000000e+00> : vector<8x128xf32>
    %8 = tpu.matmul %6, %7, %cst_9 {dimension_numbers = #tpu.dot_dimension_numbers<[1], [0], [0], [1], [0, 0, 1, 1], [], []>} : vector<8x8xf32>, vector<8x128xf32>, vector<8x128xf32> -> vector<8x128xf32>
    %9 = vector.broadcast %1 : vector<1x128xf32> to vector<8x128xf32>
    %10 = arith.addf %8, %9 : vector<8x128xf32>
    %c0_10 = arith.constant 0 : index
    %c0_11 = arith.constant 0 : index
    %c0_12 = arith.constant 0 : index
    %11 = vector.load %arg4[%c0_10, %c0_11, %c0_12] : memref<2x8x128xf32, #tpu.memory_space<vmem>>, vector<1x8x128xf32>
    %12 = vector.shape_cast %11 : vector<1x8x128xf32> to vector<8x128xf32>
    %13 = vector.shape_cast %10 : vector<8x128xf32> to vector<1x8x128xf32>
    tpu.vector_store %arg4[%c0_10, %c0_11, %c0_12], %13 {strides = array<i32>} : memref<2x8x128xf32, #tpu.memory_space<vmem>>, vector<1x8x128xf32>,
    %c1 = arith.constant 1 : index
    %c0_13 = arith.constant 0 : index
    %c0_14 = arith.constant 0 : index
    %14 = vector.load %arg1[%c1, %c0_13, %c0_14] : memref<2x8x8xf32, #tpu.memory_space<vmem>>, vector<1x8x8xf32>
    %15 = vector.shape_cast %14 : vector<1x8x8xf32> to vector<8x8xf32>
    %16 = vector.extract_strided_slice %4 {offsets = [8, 0], sizes = [8, 128], strides = [1, 1]} : vector<16x128xf32> to vector<8x128xf32>
    %cst_15 = arith.constant dense<0.000000e+00> : vector<8x128xf32>
    %17 = tpu.matmul %15, %16, %cst_15 {dimension_numbers = #tpu.dot_dimension_numbers<[1], [0], [0], [1], [0, 0, 1, 1], [], []>} : vector<8x8xf32>, vector<8x128xf32>, vector<8x128xf32> -> vector<8x128xf32>
    %18 = vector.broadcast %1 : vector<1x128xf32> to vector<8x128xf32>
    %19 = arith.addf %17, %18 : vector<8x128xf32>
    %c1_16 = arith.constant 1 : index
    %c0_17 = arith.constant 0 : index
    %c0_18 = arith.constant 0 : index
    %20 = vector.load %arg4[%c1_16, %c0_17, %c0_18] : memref<2x8x128xf32, #tpu.memory_space<vmem>>, vector<1x8x128xf32>
    %21 = vector.shape_cast %20 : vector<1x8x128xf32> to vector<8x128xf32>
    %22 = vector.shape_cast %19 : vector<8x128xf32> to vector<1x8x128xf32>
    tpu.vector_store %arg4[%c1_16, %c0_17, %c0_18], %22 {strides = array<i32>} : memref<2x8x128xf32, #tpu.memory_space<vmem>>, vector<1x8x128xf32>,
    return
  }
}

</mosaic_0001>

<bundles_post_ra>
// kernel: tpu_custom_call.1
= control target key start
LH: loop header
LB: loop body
LE: loop exit
PB: predicated region body
PF: predicated region fallthrough
CT: control target
= control target key end

     0   :  { %9 = vsyncpa [#allocation3], 0  ;;  %s574_s0 = inlined_call_operand.hbm [shape: f32[2,8,32], index: 0, kind: input, shape index: {}]   ;;  %s575_s1 = inlined_call_operand.hbm [shape: f32[2,8,8], index: 1, kind: input, shape index: {}]   ;;  %s576_s2 = inlined_call_operand.hbm [shape: f32[32,128], index: 2, kind: input, shape index: {}]   ;;  %s577_s3 = inlined_call_operand.vmem [shape: f32[1,128], index: 3, kind: input, shape index: {}]   ;;  %s578_s4 = inlined_call_operand.hbm [shape: f32[2,8,128], index: 4, kind: output, shape index: {}]  }
   0x1   :  { %10 = vsyncpa [#allocation6], 0 }
   0x2   :  { %11 = vsyncpa [#allocation4], 0  ;;  %s471_s15 = smov [#allocation5]   ;;  %s472_s17 = smov [#allocation2]  }
   0x3   :  { %s29_s16 = sshll.u32 %s471_s15, 4  ;;  %s17_s18 = sshll.u32 %s472_s17, 4  ;;  %s30_s16 = int_to_ptr.vmem [resolvable:$true] %s29_s16  ;;  %s504_s18 = int_to_ptr.vmem [resolvable:$true] %s17_s18 }
   0x4   :  { %s377_s21 = scalar_lea.hbm %s575_s1, 256 }
   0x5   :  { %p378_p0 = scmp.ne.s32.totalorder %s575_s1, %s377_s21  ;;  %p381_p1 = scmp.lt.u32.totalorder %s377_s21, %s575_s1 }
   0x7   :  { %p383_p2 = pnand %p381_p1, %p378_p0 }
   0x9   :  { %386 = shalt.err (!%p383_p2)
}
   0xa   :  { %s387_s26 = scalar_lea.vmem %s30_s16, 256  ;;  %p392_p4 = scmp.lt.s32.totalorder %s30_s16, %s30_s16 }
   0xb   :  { %p388_p3 = scmp.ne.s32.totalorder %s30_s16, %s387_s26  ;;  %p393_p5 = scmp.lt.s32.totalorder %s387_s26, %s387_s26 }
   0xd   :  { %p394_p6 = por %p393_p5, %p392_p4 }
   0xf   :  { %p395_p7 = pnand %p394_p6, %p388_p3 }
  0x11   :  { %398 = shalt.err (!%p395_p7)
}
  0x12   :  { %s473_s27 = smov 128   ;;  %s474_s28 = smov 8  }
  0x13   :  { %35 = dma.hbm_to_vmem [thread:$0]  %s575_s1, 256, %s30_s16, [#allocation6], %s473_s27, %s473_s27, %s474_s28  }
  0x14   :  { %s399_s7 = scalar_lea.hbm %s574_s0, 256 }
  0x15   :  { %p400_p8 = scmp.ne.s32.totalorder %s574_s0, %s399_s7  ;;  %p403_p9 = scmp.lt.u32.totalorder %s399_s7, %s574_s0 }
  0x17   :  { %p405_p10 = pnand %p403_p9, %p400_p8 }
  0x19   :  { %408 = shalt.err (!%p405_p10)
}
  0x1a   :  { %s409_s12 = scalar_lea.vmem %s504_s18, 256  ;;  %p414_p12 = scmp.lt.s32.totalorder %s504_s18, %s504_s18 }
  0x1b   :  { %p410_p11 = scmp.ne.s32.totalorder %s504_s18, %s409_s12  ;;  %p415_p13 = scmp.lt.s32.totalorder %s409_s12, %s409_s12 }
  0x1d   :  { %p416_p0 = por %p415_p13, %p414_p12 }
  0x1f   :  { %p417_p1 = pnand %p416_p0, %p410_p11 }
  0x21   :  { %420 = shalt.err (!%p417_p1)
}
  0x22   :  { %23 = dma.hbm_to_vmem [thread:$0]  %s574_s0, 256, %s504_s18, [#allocation3], %s473_s27, %s473_s27, %s474_s28  }
  0x23   :  { %s475_s14 = smov [#allocation7]   ;;  %s421_s19 = scalar_lea.hbm %s576_s2, 512 }
  0x24   :  { %s41_s15 = sshll.u32 %s475_s14, 4  ;;  %p422_p2 = scmp.ne.s32.totalorder %s576_s2, %s421_s19  ;;  %s42_s15 = int_to_ptr.vmem [resolvable:$true] %s41_s15 }
  0x25   :  { %p425_p3 = scmp.lt.u32.totalorder %s421_s19, %s576_s2 }
  0x27   :  { %p427_p4 = pnand %p425_p3, %p422_p2 }
  0x29   :  { %430 = shalt.err (!%p427_p4)
}
  0x2a   :  { %s431_s24 = scalar_lea.vmem %s42_s15, 512  ;;  %p436_p6 = scmp.lt.s32.totalorder %s42_s15, %s42_s15 }
  0x2b   :  { %p432_p5 = scmp.ne.s32.totalorder %s42_s15, %s431_s24  ;;  %p437_p7 = scmp.lt.s32.totalorder %s431_s24, %s431_s24 }
  0x2d   :  { %p438_p8 = por %p437_p7, %p436_p6 }
  0x2f   :  { %p439_p9 = pnand %p438_p8, %p432_p5 }
  0x31   :  { %442 = shalt.err (!%p439_p9)
}
  0x32   :  { %47 = dma.hbm_to_vmem [thread:$0]  %s576_s2, 512, %s42_s15, [#allocation6], %s473_s27, %s473_s27, %s474_s28  }
  0x33   :  { %465 = dma.done.wait [#allocation3], 256  }
  0x34   :  { %466 = vsyncadd [#allocation3], 4294967040 }
  0x35   :  { %467 = dma.done.wait [#allocation6], 768  }
  0x36   :  { %468 = vsyncadd [#allocation6], 4294966528  ;;  %vm66_vm0 = vcmask 261120   ;;  %v59_v0 = vld [vmem:[#allocation7] sm:$0xff]  ;;  %v60_v1 = vld [vmem:[#allocation7 + $0x8] sm:$0xff]  ;;  %v476_v8 = vmov 0.0  }
  0x37   :  { %v61_v2 = vld [vmem:[#allocation7 + $0x10] sm:$0xff]  ;;  %v361_v3 = vpack.c.bf16 %v60_v1, %v59_v0  ;;  %v62_v4 = vld [vmem:[#allocation7 + $0x18] sm:$0xff]  ;;  %v64_v5 = vld [vmem:[#allocation2] sm:$0xff]  ;;  %351 = vmatprep.subr.mxu1 %v476_v8  ;;  %vm477_vm1 = vmmov 0   ;;  %vm155_vm2 = vcmask 64512   ;;  %s478_s26 = smov [#allocation8]  }
  0x38   :  { %v365_v6 = vpack.c.bf16 %v62_v4, %v61_v2  ;;  %348 = vmatprep.mubr.msk.f32.mxu0 %vm66_vm0, %v64_v5  ;;  %v65_v7 = vld [vmem:[#allocation2 + $0x8] sm:$0xff]  ;;  %353 = vmatprep.mubr.msk.f32.mxu1 %vm477_vm1, %v476_v8  ;;  %v148_v10 = vld [vmem:[#allocation5] sm:$0xff]  ;;  %v231_v12 = vld [vmem:[#allocation5 + $0x8] sm:$0xff]  ;;  %s312_s29 = sshll.u32 %s478_s26, 4  ;;  %s313_s29 = int_to_ptr.vmem [resolvable:$true] %s312_s29 }
  0x39   :  { %362 = vmatprep.subr.bf16.mxu0 %v361_v3  ;;  %v327_v13 = vld [vmem:[%s577_s3] ss:$0 sm:$0xff]  ;;  %s443_s30 = scalar_lea.vmem %s313_s29, 256  ;;  %p448_p11 = scmp.lt.s32.totalorder %s313_s29, %s313_s29 }
  0x3a   :  { %364 = vmatpush3.bf16.msra.mxu0 %v361_v3  ;;  %p444_p10 = scmp.ne.s32.totalorder %s313_s29, %s443_s30  ;;  %p449_p12 = scmp.lt.s32.totalorder %s443_s30, %s443_s30 }
  0x3b   :  { %366 = vmatprep.subr.bf16.mxu0 %v365_v6 }
  0x3c   :  { %p450_p13 = por %p449_p12, %p448_p11 }
  0x3e   :  { %368 = vmatpush3.bf16.msra.mxu0 %v365_v6  ;;  %p451_p0 = pnand %p450_p13, %p444_p10 }
  0x41   :  { %349 = vmatmul.mubr.msk.f32.vlgmr.msra.gmra.mrb[0].mxu0 %vm66_vm0, %v65_v7 }
 0x114   :  { %v350_v9 = vpop.f32.mrb[0].mxu0 }
 0x115   :  { %v139_v11 = vpop.f32.mrb[1].mxu0 }
 0x116   :  { %352 = vmatpush3.msra.mxu1 %v139_v11 }
 0x117   :  { %354 = vmatmul.mubr.msk.f32.vlgmr.msra.gmra.mrb[0].mxu1 %vm155_vm2, %v148_v10  ;;  %356 = vmatprep.subr.mxu1 %v476_v8 }
 0x118   :  { %357 = vmatpush3.msra.mxu1 %v350_v9  ;;  %358 = vmatprep.mubr.msk.f32.mxu1 %vm477_vm1, %v476_v8 }
 0x11b   :  { %359 = vmatmul.mubr.msk.f32.vlgmr.msra.gmra.mrb[2].mxu1 %vm155_vm2, %v231_v12 }
 0x1ea   :  { %v225_v14 = vpop.f32.mrb[0].mxu1 }
 0x1eb   :  { %v226_v15 = vadd.f32 %v327_v13, %v225_v14  ;;  %v355_v16 = vpop.f32.mrb[1].mxu1 }
 0x1ed   :  { %229 = vst [vmem:[#allocation8] sm:$0xff] %v226_v15 }
 0x1ee   :  { %v301_v17 = vpop.f32.mrb[2].mxu1 }
 0x1ef   :  { %v302_v18 = vadd.f32 %v327_v13, %v301_v17  ;;  %v360_v19 = vpop.f32.mrb[3].mxu1 }
 0x1f1   :  { %306 = vst [vmem:[#allocation8 + $0x8] sm:$0xff] %v302_v18 }
 0x1f2   :  { %454 = shalt.err (!%p451_p0)
}
 0x1f3   :  { %s455_s6 = scalar_lea.hbm %s578_s4, 256 }
 0x1f4   :  { %p456_p1 = scmp.ne.s32.totalorder %s578_s4, %s455_s6  ;;  %p459_p2 = scmp.lt.u32.totalorder %s455_s6, %s578_s4 }
 0x1f6   :  { %p461_p3 = pnand %p459_p2, %p456_p1 }
 0x1f8   :  { %464 = shalt.err (!%p461_p3)
}
 0x1f9   :  { %318 = dma.vmem_to_hbm [thread:$0]  %s313_s29, 256, %s578_s4, [#allocation4], %s473_s27, %s473_s27, %s474_s28  }
 0x1fa   :  { %469 = dma.done.wait [#allocation4], 256  }
 0x1fb   :  { %470 = vsyncadd [#allocation4], 4294967040 }
 0x1fc   :  { %322 = vsyncpa [#allocation3], 1 }
 0x1fd   :  { %323 = vsyncpa [#allocation6], 1 }
 0x1fe   :  { %324 = vsyncpa [#allocation4], 1 }

</bundles_post_ra>
